<compile_context>
chip_gen: v5e
topology: v5e:2x2
jax: 0.10.0
libtpu: 0.0.40
codegen_flags: <defaults>
</compile_context>

<pallas_src>
import functools

import jax
import jax.numpy as jnp
from jax.experimental import pallas as pl
from jax.experimental.pallas import tpu as pltpu

_LANES = 128       # lane width (last dim of every tile)
_MAX_TR = 4096     # max sublane rows per grid step (2 MiB f32 per input block)
_NUM_CORES = 2     # leading parallel grid axis (megacore split on v7x)


def _round_up(x, m):
    return ((x + m - 1) // m) * m


def _bce_elem(x, t):
    # Numerically stable fused sigmoid + BCE (logit form):
    #   loss = relu(x) - x*t + log1p(exp(-|x|))
    # clamped at 100 to mirror PyTorch's -100 log clamp for binary targets.
    # TODO(synk): for 16.6 < |x| < 100 PyTorch's saturated f32 sigmoid hits the
    # -100 clamp (loss exactly 100) while this logit-exact form returns ~|x|;
    # the logit form is the more accurate of the two.
    loss = jnp.maximum(x, 0.0) - x * t + jnp.log1p(jnp.exp(-jnp.abs(x)))
    return jnp.minimum(loss, 100.0)


def _bce_kernel(x_ref, t_ref, out_ref, acc_ref, *, steps, nblocks, valid_rows, tr):
    c = pl.program_id(0)          # core (parallel) axis
    i = pl.program_id(1)          # per-core streaming step
    blk = c * steps + i           # global row-block index loaded this step

    @pl.when(i == 0)
    def _init():
        acc_ref[...] = jnp.zeros_like(acc_ref)

    x = x_ref[...].astype(jnp.float32)
    t = t_ref[...].astype(jnp.float32)
    loss = _bce_elem(x, t)

    @pl.when(blk < nblocks - 1)
    def _accum():
        # full in-range block: clean elementwise (8,128) partial sums (VPU only)
        acc_ref[...] += loss.reshape(tr // 8, 8, _LANES).sum(axis=0)

    @pl.when(blk == nblocks - 1)
    def _ragged():
        # only the last global block can contain out-of-range rows -> mask here only
        row = jax.lax.broadcasted_iota(jnp.int32, loss.shape, 0) + blk * tr
        masked = jnp.where(row < valid_rows, loss, 0.0)
        acc_ref[...] += masked.reshape(tr // 8, 8, _LANES).sum(axis=0)

    # blocks with blk >= nblocks (odd nblocks, duplicate of the clamped index
    # map) fall through both branches and contribute nothing.

    @pl.when(i == steps - 1)
    def _finish():
        # per-core (8,128) partial-sum slab; final reduction is done in the wrapper
        out_ref[...] = acc_ref[...]


def bce_loss_pallas(inputs, targets):
    """Mean BCE(sigmoid(inputs), targets) over all elements (any shape / dtype)."""
    x = inputs.reshape(-1)
    t = targets.reshape(-1)
    n = x.shape[0]

    rem = n % _LANES
    n_main = n - rem

    total = jnp.zeros((), jnp.float32)

    if n_main > 0:
        rows = n_main // _LANES
        x2 = x[:n_main].reshape(rows, _LANES)
        t2 = t[:n_main].reshape(rows, _LANES)

        # sublane alignment for the narrowest streamed dtype: f32->8, bf16->16, int8/bool->32
        align = max(8,
                    32 // max(jnp.dtype(x2.dtype).itemsize, 1),
                    32 // max(jnp.dtype(t2.dtype).itemsize, 1))
        # rows per grid step: as large as possible, split so both cores get work on v7x
        tr = min(_MAX_TR, _round_up(pl.cdiv(rows, _NUM_CORES), align))
        nblocks = pl.cdiv(rows, tr)
        steps = pl.cdiv(nblocks, _NUM_CORES)

        kernel = functools.partial(
            _bce_kernel, steps=steps, nblocks=nblocks, valid_rows=rows, tr=tr)

        def in_map(c, i):
            # clamp trailing duplicate blocks in-bounds; the kernel skips them
            return (jnp.minimum(c * steps + i, nblocks - 1), 0)

        partials = pl.pallas_call(
            kernel,
            out_shape=jax.ShapeDtypeStruct((_NUM_CORES * 8, _LANES), jnp.float32),
            grid_spec=pltpu.PrefetchScalarGridSpec(
                num_scalar_prefetch=0,
                grid=(_NUM_CORES, steps),
                in_specs=[
                    pl.BlockSpec((tr, _LANES), in_map),
                    pl.BlockSpec((tr, _LANES), in_map),
                ],
                out_specs=pl.BlockSpec((8, _LANES), lambda c, i: (c, 0)),
                scratch_shapes=[pltpu.VMEM((8, _LANES), jnp.float32)],
            ),
            compiler_params=pltpu.CompilerParams(
                dimension_semantics=("parallel", "arbitrary"),
            ),
        )(x2, t2)

        total = total + jnp.sum(partials)

    if rem:
        # <128-element ragged tail: cheaper in plain JAX than re-streaming the
        # padded full inputs through HBM
        xt = x[n_main:].astype(jnp.float32)
        tt = t[n_main:].astype(jnp.float32)
        total = total + jnp.sum(_bce_elem(xt, tt))

    return total / n


if __name__ == "__main__":
    key = jax.random.PRNGKey(0)
    k1, k2 = jax.random.split(key)

    # NCHW inputs like the segmentation use case
    x = jax.random.normal(k1, (2, 4, 16, 16), dtype=jnp.float32)
    targets = (jax.random.uniform(k2, (2, 4, 16, 16)) > 0.5).astype(jnp.float32)

    loss = bce_loss_pallas(x, targets)
    jax.block_until_ready(loss)

    # reference check in plain JAX (matches torch.sigmoid + F.binary_cross_entropy)
    p = jax.nn.sigmoid(x).reshape(-1)
    t = targets.reshape(-1)
    ref = jnp.mean(-(t * jnp.maximum(jnp.log(p), -100.0)
                     + (1.0 - t) * jnp.maximum(jnp.log1p(-p), -100.0)))
    assert jnp.allclose(loss, ref, atol=1e-5, rtol=1e-5), (loss, ref)

    print("KERNEL_OK")
</pallas_src>

<mosaic_0001>
module attributes {stable_mosaic.version = 11 : i64} {
  func.func @_bce_kernel(%arg0: i32, %arg1: i32, %arg2: memref<8x128xf32, #tpu.memory_space<vmem>>, %arg3: memref<8x128xf32, #tpu.memory_space<vmem>>, %arg4: memref<8x128xf32, #tpu.memory_space<vmem>>, %arg5: memref<8x128xf32, #tpu.memory_space<vmem>>) attributes {dimension_semantics = [#tpu.dimension_semantics<parallel>, #tpu.dimension_semantics<arbitrary>], iteration_bounds = array<i64: 2, 1>, scalar_prefetch = 0 : i64, scratch_operands = 1 : i64, tpu.core_type = #tpu.core_type<tc>, window_params = [{transform_indices = @transform_0, window_bounds = array<i64: 8, 128>}, {transform_indices = @transform_1, window_bounds = array<i64: 8, 128>}, {transform_indices = @transform_2, window_bounds = array<i64: 8, 128>}]} {
    %c1_i32 = arith.constant 1 : i32
    %0 = arith.muli %arg0, %c1_i32 : i32
    %1 = arith.addi %0, %arg1 : i32
    %c0_i32 = arith.constant 0 : i32
    %2 = arith.cmpi eq, %arg1, %c0_i32 : i32
    %3 = arith.extui %2 : i1 to i32
    %c0_i32_0 = arith.constant 0 : i32
    %4 = arith.cmpi ne, %3, %c0_i32_0 : i32
    scf.if %4 {
      %cst_12 = arith.constant 0.000000e+00 : f32
      %28 = vector.broadcast %cst_12 : f32 to vector<8x128xf32>
      %c0_13 = arith.constant 0 : index
      %c0_14 = arith.constant 0 : index
      %29 = vector.load %arg5[%c0_13, %c0_14] : memref<8x128xf32, #tpu.memory_space<vmem>>, vector<8x128xf32>
      tpu.vector_store %arg5[%c0_13, %c0_14], %28 {strides = array<i32>} : memref<8x128xf32, #tpu.memory_space<vmem>>, vector<8x128xf32>,
    } else {
    }
    %c0 = arith.constant 0 : index
    %c0_1 = arith.constant 0 : index
    %5 = vector.load %arg2[%c0, %c0_1] : memref<8x128xf32, #tpu.memory_space<vmem>>, vector<8x128xf32>
    %c0_2 = arith.constant 0 : index
    %c0_3 = arith.constant 0 : index
    %6 = vector.load %arg3[%c0_2, %c0_3] : memref<8x128xf32, #tpu.memory_space<vmem>>, vector<8x128xf32>
    %cst = arith.constant 0.000000e+00 : f32
    %7 = vector.broadcast %cst : f32 to vector<8x128xf32>
    %8 = arith.maximumf %5, %7 : vector<8x128xf32>
    %9 = arith.mulf %5, %6 : vector<8x128xf32>
    %10 = arith.subf %8, %9 : vector<8x128xf32>
    %11 = math.absf %5 : vector<8x128xf32>
    %cst_4 = arith.constant 0.000000e+00 : f32
    %12 = vector.broadcast %cst_4 : f32 to vector<8x128xf32>
    %13 = arith.subf %12, %11 : vector<8x128xf32>
    %14 = math.exp %13 : vector<8x128xf32>
    %15 = math.log1p %14 : vector<8x128xf32>
    %16 = arith.addf %10, %15 : vector<8x128xf32>
    %cst_5 = arith.constant 1.000000e+02 : f32
    %17 = vector.broadcast %cst_5 : f32 to vector<8x128xf32>
    %18 = arith.minimumf %16, %17 : vector<8x128xf32>
    %c1_i32_6 = arith.constant 1 : i32
    %19 = arith.cmpi slt, %1, %c1_i32_6 : i32
    %20 = arith.extui %19 : i1 to i32
    %c0_i32_7 = arith.constant 0 : i32
    %21 = arith.cmpi ne, %20, %c0_i32_7 : i32
    scf.if %21 {
      %c0_12 = arith.constant 0 : index
      %c0_13 = arith.constant 0 : index
      %28 = vector.load %arg5[%c0_12, %c0_13] : memref<8x128xf32, #tpu.memory_space<vmem>>, vector<8x128xf32>
      %29 = vector.shape_cast %18 : vector<8x128xf32> to vector<1x8x128xf32>
      %cst_14 = arith.constant dense<0.000000e+00> : vector<8x128xf32>
      %30 = vector.multi_reduction <add>, %29, %cst_14 [0] : vector<1x8x128xf32> to vector<8x128xf32>
      %31 = arith.addf %28, %30 : vector<8x128xf32>
      %c0_15 = arith.constant 0 : index
      %c0_16 = arith.constant 0 : index
      %32 = vector.load %arg5[%c0_15, %c0_16] : memref<8x128xf32, #tpu.memory_space<vmem>>, vector<8x128xf32>
      tpu.vector_store %arg5[%c0_15, %c0_16], %31 {strides = array<i32>} : memref<8x128xf32, #tpu.memory_space<vmem>>, vector<8x128xf32>,
    } else {
    }
    %c1_i32_8 = arith.constant 1 : i32
    %22 = arith.cmpi eq, %1, %c1_i32_8 : i32
    %23 = arith.extui %22 : i1 to i32
    %c0_i32_9 = arith.constant 0 : i32
    %24 = arith.cmpi ne, %23, %c0_i32_9 : i32
    scf.if %24 {
      %28 = tpu.iota {dimensions = array<i32: 0>} : vector<8x128xi32>
      %c8_i32 = arith.constant 8 : i32
      %29 = arith.muli %1, %c8_i32 : i32
      %30 = vector.broadcast %29 : i32 to vector<8x128xi32>
      %31 = arith.addi %28, %30 : vector<8x128xi32>
      %c16_i32 = arith.constant 16 : i32
      %32 = vector.broadcast %c16_i32 : i32 to vector<8x128xi32>
      %33 = arith.cmpi slt, %31, %32 : vector<8x128xi32>
      %cst_12 = arith.constant 0.000000e+00 : f32
      %34 = vector.broadcast %cst_12 : f32 to vector<8x128xf32>
      %35 = arith.select %33, %18, %34 : vector<8x128xi1>, vector<8x128xf32>
      %c0_13 = arith.constant 0 : index
      %c0_14 = arith.constant 0 : index
      %36 = vector.load %arg5[%c0_13, %c0_14] : memref<8x128xf32, #tpu.memory_space<vmem>>, vector<8x128xf32>
      %37 = vector.shape_cast %35 : vector<8x128xf32> to vector<1x8x128xf32>
      %cst_15 = arith.constant dense<0.000000e+00> : vector<8x128xf32>
      %38 = vector.multi_reduction <add>, %37, %cst_15 [0] : vector<1x8x128xf32> to vector<8x128xf32>
      %39 = arith.addf %36, %38 : vector<8x128xf32>
      %c0_16 = arith.constant 0 : index
      %c0_17 = arith.constant 0 : index
      %40 = vector.load %arg5[%c0_16, %c0_17] : memref<8x128xf32, #tpu.memory_space<vmem>>, vector<8x128xf32>
      tpu.vector_store %arg5[%c0_16, %c0_17], %39 {strides = array<i32>} : memref<8x128xf32, #tpu.memory_space<vmem>>, vector<8x128xf32>,
    } else {
    }
    %c0_i32_10 = arith.constant 0 : i32
    %25 = arith.cmpi eq, %arg1, %c0_i32_10 : i32
    %26 = arith.extui %25 : i1 to i32
    %c0_i32_11 = arith.constant 0 : i32
    %27 = arith.cmpi ne, %26, %c0_i32_11 : i32
    scf.if %27 {
      %c0_12 = arith.constant 0 : index
      %c0_13 = arith.constant 0 : index
      %28 = vector.load %arg5[%c0_12, %c0_13] : memref<8x128xf32, #tpu.memory_space<vmem>>, vector<8x128xf32>
      %c0_14 = arith.constant 0 : index
      %c0_15 = arith.constant 0 : index
      %29 = vector.load %arg4[%c0_14, %c0_15] : memref<8x128xf32, #tpu.memory_space<vmem>>, vector<8x128xf32>
      tpu.vector_store %arg4[%c0_14, %c0_15], %28 {strides = array<i32>} : memref<8x128xf32, #tpu.memory_space<vmem>>, vector<8x128xf32>,
    } else {
    }
    return
  }
  func.func @transform_0(%arg0: i32, %arg1: i32) -> (i32, i32) {
    %c1_i32 = arith.constant 1 : i32
    %0 = arith.muli %arg0, %c1_i32 : i32
    %1 = arith.addi %0, %arg1 : i32
    %c1_i32_0 = arith.constant 1 : i32
    %2 = arith.minsi %1, %c1_i32_0 : i32
    %c0_i32 = arith.constant 0 : i32
    %c0_i32_1 = arith.constant 0 : i32
    return %2, %c0_i32 : i32, i32
  }
  func.func @transform_1(%arg0: i32, %arg1: i32) -> (i32, i32) {
    %c1_i32 = arith.constant 1 : i32
    %0 = arith.muli %arg0, %c1_i32 : i32
    %1 = arith.addi %0, %arg1 : i32
    %c1_i32_0 = arith.constant 1 : i32
    %2 = arith.minsi %1, %c1_i32_0 : i32
    %c0_i32 = arith.constant 0 : i32
    %c0_i32_1 = arith.constant 0 : i32
    return %2, %c0_i32 : i32, i32
  }
  func.func @transform_2(%arg0: i32, %arg1: i32) -> (i32, i32) {
    %c0_i32 = arith.constant 0 : i32
    %c0_i32_0 = arith.constant 0 : i32
    return %arg0, %c0_i32 : i32, i32
  }
}

</mosaic_0001>

<bundles_post_ra>
// kernel: tpu_custom_call.1
= control target key start
LH: loop header
LB: loop body
LE: loop exit
PB: predicated region body
PF: predicated region fallthrough
CT: control target
= control target key end

     0   :  { %s879_s0 = inlined_call_operand.hbm [shape: f32[16,128], index: 0, kind: input, shape index: {}]   ;;  %s880_s1 = inlined_call_operand.hbm [shape: f32[16,128], index: 1, kind: input, shape index: {}]   ;;  %s881_s2 = inlined_call_operand.hbm [shape: f32[16,128], index: 2, kind: output, shape index: {}]  }
   0x1   :  { %884 = sst [smem:[#allocation14_spill]] %s879_s0 }
   0x2   :  { %7 = vsyncpa [#allocation4], 0 }
   0x3   :  { %9 = vsyncpa [#allocation4 + $0x1], 0 }
   0x4   :  { %10 = vsyncpa [#allocation7], 0 }
   0x5   :  { %12 = vsyncpa [#allocation7 + $0x1], 0 }
   0x6   :  { %13 = vsyncpa [#allocation5], 0 }
   0x7   :  { %15 = vsyncpa [#allocation5 + $0x1], 0  ;;  %s710_s9 = smov 0   ;;  %s712_s10 = smov 0  }
   0x8   :  { %s714_s11 = smov 0   ;;  %s716_s12 = smov 0  }
   0x9   :  { %s718_s13 = smov 0   ;;  %s720_s14 = smov 0  }
   0xa   :  { %s722_s15 = smov 0   ;;  %s724_s16 = smov 0  }
   0xb   :  { %s726_s17 = smov 0  }
   0xc LB: > { %885 = sst [smem:[#allocation12_spill]] %s688_s16  ;;  %s407_s18 = sadd.s32 4294967295, %s692_s17   ;;  %s692_s17 = sphi %s726_s17, %s21_s17   ;;  %s688_s16 = sphi %s724_s16, %s893_s16   ;;  %s684_s15 = sphi %s722_s15, %s892_s15   ;;  %s680_s14 = sphi %s720_s14, %s899_s14   ;;  %s676_s13 = sphi %s718_s13, %s898_s13   ;;  %s672_s12 = sphi %s716_s12, %s897_s12   ;;  %s668_s11 = sphi %s714_s11, %s896_s11   ;;  %s664_s10 = sphi %s712_s10, %s895_s10   ;;  %s660_s9 = sphi %s710_s9, %s894_s9  }
   0xd   : > { %s408_s19 = sadd.s32 4294967294, %s692_s17   ;;  %s33_s20 = sadd.s32 1, %s688_s16 }
   0xe   : > { %p38_p0 = scmp.lt.s32.totalorder %s688_s16, 1  ;;  %p35_p1 = scmp.ge.s32.totalorder %s33_s20, 2 }
   0xf   : > { %s46_s21 = sadd.s32 1, %s680_s14  ;;  %p53_p2 = scmp.ne.s32.totalorder %s680_s14, %s676_s13 }
  0x10   : > { %s759_s22 = scalar_select %p38_p0, %s688_s16, 1 }
  0x11   : > { %s901_s20 = smov (%p35_p1, %s33_s20), 0  ;;  %p54_p3 = scmp.eq.s32.totalorder %s692_s17, 0 }
  0x12   : > { %886 = sst [smem:[#allocation13_spill]] %s901_s20  ;;  %p41_p4 = scmp.lt.s32.totalorder %s901_s20, 1 }
  0x13   : > { %p59_p5 = scmp.ne.s32.totalorder %s676_s13, %s672_s12  ;;  %p768_p6 = por %p54_p3, %p53_p2 }
  0x14   : > { %p60_p7 = scmp.eq.s32.totalorder %s407_s18, 0  ;;  %s101_s26 = ssub.s32 %s688_s16, %s901_s20 }
  0x15   : > { %s42_s24 = scalar_select %p41_p4, %s901_s20, 1 }
  0x16   : > { %p773_p8 = por %p60_p7, %p59_p5  ;;  %p102_p9 = scmp.eq.s32.totalorder %s101_s26, 0 }
  0x17   : > { %s43_s27 = ssub.s32 %s759_s22, %s42_s24  ;;  %s104_s28 = sadd.s32 1, %s668_s11 }
  0x18   : > { %p44_p10 = scmp.eq.s32.totalorder %s43_s27, 0  ;;  %p114_p11 = scmp.ne.s32.totalorder %s668_s11, %s664_s10 }
  0x19   : > { %s782_s29 = scalar_select %p102_p9, %s668_s11, %s104_s28  }
  0x1a   : > { %s785_s30 = scalar_select %p44_p10, %s680_s14, %s46_s21  }
  0x1b   : > { %p115_p12 = scmp.eq.s32.totalorder %s407_s18, 1  ;;  %p120_p13 = scmp.ne.s32.totalorder %s664_s10, %s660_s9 }
  0x1c   : > { %p121_p0 = scmp.eq.s32.totalorder %s408_s19, 1  ;;  %p410_p2 = scmp.ge.s32.totalorder %s692_s17, 2 }
  0x1d   : > { %p791_p1 = por %p115_p12, %p114_p11  ;;  %p443_p4 = scmp.lt.s32.totalorder %s692_s17, 2 }
  0x1e   : > { %p796_p3 = por %p121_p0, %p120_p13  ;;  %s141_s5 = sand.u32 1, %s680_s14  }
  0x1f   : > { %s412_s6 = sshll.u32 %s759_s22, 3  ;;  %s411_s7 = sshll.u32 %s141_s5, 3 }
  0x20   : > { %s891_s0 = sld [smem:[#allocation14_spill]]  ;;  %s145_s19 = scalar_lea.vmem [#allocation3], %s411_s7 }
  0x21   : > { %s156_s24 = sshll.u32 %s145_s19, 4  ;;  %p433_p5 = pnand %p443_p4, %p768_p6  ;;  %s157_s24 = int_to_ptr.vmem [resolvable:$true] %s156_s24 }
  0x22   : > { %p415_p7 = scmp.ge.s32.totalorder %s692_s17, 1  ;;  %p183_p9 = scmp.lt.s32.totalorder %s692_s17, 3 }
  0x23   : > { %s142_s26 = scalar_lea.sflag [#allocation4], %s141_s5  ;;  %s174_s22 = scalar_lea.hbm %s880_s1, %s412_s6 }
  0x24   : > { %p184_p10 = pnand %p415_p7, %p183_p9  ;;  %s176_s20 = sshll.u32 %s174_s22, 4  ;;  %s177_s20 = int_to_ptr.hbm [resolvable:$true] %s176_s20 }
  0x25   : > { %s167_s16 = scalar_lea.vmem [#allocation6], %s411_s7  ;;  %s164_s12 = scalar_lea.sflag [#allocation7], %s141_s5 }
  0x26   : > { %s152_s18 = scalar_lea.hbm %s891_s0, %s412_s6  ;;  %s178_s8 = sshll.u32 %s167_s16, 4  ;;  %s179_s8 = int_to_ptr.vmem [resolvable:$true] %s178_s8 }
  0x27   : > { %s154_s21 = sshll.u32 %s152_s18, 4  ;;  %187 = sbr.rel (%p184_p10) target bundleno = 114 (0x72), region = 28  ;;  %s155_s21 = int_to_ptr.hbm [resolvable:$true] %s154_s21 }
  0x28   : > { %435 = dma.hbm_to_vmem [thread:$0]  (!%p433_p5), %s155_s21, 128, %s157_s24, %s142_s26  }
  0x29   : > { %438 = dma.hbm_to_vmem [thread:$0]  (!%p433_p5), %s177_s20, 128, %s179_s8, %s164_s12  }
  0x2a   : > { %s189_s23 = sand.u32 (!%p184_p10), 1, %s676_s13  }
  0x2b   : > { %s416_s18 = sshll.u32 (!%p184_p10), %s189_s23, 3  ;;  %s190_s19 = scalar_lea.sflag (!%p184_p10), [#allocation4], %s189_s23 }
  0x2c   : > { %s193_s0 = scalar_lea.vmem [#allocation3], %s416_s18 }
  0x2d   : > { %647 = dma.done.wait (%p773_p8), %s190_s19, 128  }
  0x2e   : > { %649 = vsyncadd (%p773_p8), %s190_s19, 4294967168  ;;  %s200_s6 = scalar_lea.sflag [#allocation7], %s189_s23  ;;  %s203_s7 = scalar_lea.vmem [#allocation6], %s416_s18 }
  0x2f   : > { %651 = dma.done.wait (%p773_p8), %s200_s6, 128  }
  0x30   : > { %653 = vsyncadd (%p773_p8), %s200_s6, 4294967168  ;;  %s227_s16 = sand.u32 1, %s664_s10   ;;  %v694_v0 = vmov 0.0   ;;  %v242_v1 = vld [vmem:[%s193_s0] sm:$0xff]  ;;  %v243_v8 = vld [vmem:[%s203_s7] sm:$0xff]  ;;  %p419_p6 = scmp.ge.s32.totalorder %s684_s15, 1 }
  0x31   : > { %s825_s20 = sshll.u32 %s227_s16, 3  ;;  %241 = vst [vmem:[#allocation2] sm:$0xff] %v694_v0  ;;  %v247_v2 = vand.u32 2147483647, %v242_v1  ;;  %v244_v10 = vmax.f32 %v242_v1, 0.0  ;;  %v245_v11 = vmul.f32 %v243_v8, %v242_v1 }
  0x32   : > { %s229_s0 = scalar_lea.vmem [#allocation8], %s825_s20 }
  0x33   : > { %v248_v3 = vsub.f32 0.0, %v247_v2  ;;  %v246_v15 = vsub.f32 %v244_v10, %v245_v11 }
  0x35   : > { %v249_v4 = vmul.f32 1.442695, %v248_v3 }
  0x37   : > { %518 = vpow2.f32 %v249_v4 }
  0x3d   : > { %v519_v5 = vpop.eup %518 }
  0x3e   : > { %v251_v6 = vadd.f32 1.0, %v519_v5  ;;  %v254_v7 = vmul.f32 -0.5, %v519_v5  ;;  %v257_v12 = vand.u32 2147483647, %v519_v5 }
  0x40   : > { %520 = vlog2.f32 %v251_v6  ;;  %v255_v9 = vadd.f32 1.0, %v254_v7  ;;  %vm258_vm0 = vcmp.lt.f32.partialorder %v257_v12, 0.0004427343 }
  0x42   : > { %v256_v13 = vmul.f32 %v519_v5, %v255_v9 }
  0x46   : > { %v521_v14 = vpop.eup %520 }
  0x47   : > { %v253_v16 = vmul.f32 0.6931472, %v521_v14 }
  0x48   : > { %265 = sbr.rel (%p419_p6) target bundleno = 81 (0x51), region = 44 }
  0x49   : > { %v259_v17 = vsel %vm258_vm0, %v256_v13, %v253_v16 }
  0x4a   : > { %v260_v18 = vadd.f32 %v259_v17, %v246_v15 }
  0x4c   : > { %v261_v19 = vmin.f32 %v260_v18, 100.0 }
  0x4d   : > { %v266_v20 = vld [vmem:[#allocation2] sm:$0xff] }
  0x4e   : > { %v268_v21 = vadd.f32 %v266_v20, %v261_v19 }
  0x50   : > { %269 = vst [vmem:[#allocation2] sm:$0xff] %v268_v21 }
  0x51 PF: > { %p420_p8 = scmp.ne.s32.totalorder %s684_s15, 1 }
  0x52   : > { %s421_s25 = sshll.u32 (!%p420_p8), %s684_s15, 3 }
  0x53   : > { %273 = sbr.rel (%p420_p8) target bundleno = 99 (0x63), region = 48 }
  0x58   : > { %v274_v22 = vlaneseq  ;;  %v277_v23 = vstv %s421_s25  ;;  %v281_v26 = vld [vmem:[#allocation2] sm:$0xff] }
  0x5a   : > { %v275_v24 = vshrl.u32 %v274_v22, 7 }
  0x5c   : > { %v278_v25 = vadd.s32 %v277_v23, %v275_v24 }
  0x5e   : > { %vm279_vm1 = vcmp.lt.s32.totalorder %v278_v25, 16 }
  0x5f   : > { %v280_v27 = vsel %vm279_vm1, %v261_v19, 0.0 }
  0x60   : > { %v283_v28 = vadd.f32 %v281_v26, %v280_v27 }
  0x62   : > { %284 = vst [vmem:[#allocation2] sm:$0xff] %v283_v28 }
  0x63 PF: > { %s423_s5 = sshll.u32 %s684_s15, 3  ;;  %s303_s27 = sshll.u32 %s229_s0, 4  ;;  %s304_s27 = int_to_ptr.vmem [resolvable:$true] %s303_s27 }
  0x64   : > { %s301_s26 = scalar_lea.hbm %s881_s2, %s423_s5  ;;  %s291_s22 = scalar_lea.sflag [#allocation5], %s227_s16 }
  0x65   : > { %s305_s28 = sshll.u32 %s301_s26, 4  ;;  %s602_s18 = scalar_lea.hbm %s881_s2, 16  ;;  %s306_s28 = int_to_ptr.hbm [resolvable:$true] %s305_s28 }
  0x66   : > { %s596_s8 = sshra.s32 %s306_s28, 4  ;;  %s597_s8 = int_to_ptr.hbm [resolvable:$true] %s596_s8 }
  0x67   : > { %s598_s12 = scalar_lea.hbm %s597_s8, 8  ;;  %p603_p0 = scmp.lt.s32.totalorder %s597_s8, %s881_s2 }
  0x68   : > { %p599_p11 = scmp.ne.s32.totalorder %s597_s8, %s598_s12  ;;  %p604_p4 = scmp.lt.s32.totalorder %s602_s18, %s598_s12 }
  0x69   : > { %v288_v29 = vld [vmem:[#allocation2] sm:$0xff] }
  0x6a   : > { %289 = vst [vmem:[%s229_s0] sm:$0xff] %v288_v29  ;;  %p600_p12 = pnand %p599_p11, %p791_p1  ;;  %p605_p5 = por %p604_p4, %p603_p0 }
  0x6c   : > { %p601_p13 = pneg %p600_p12 }
  0x6e   : > { %p606_p7 = pnand %p605_p5, %p601_p13 }
  0x70   : > { %609 = shalt.err (!%p606_p7)
}
  0x71   : > { %430 = dma.vmem_to_hbm [thread:$0]  (%p791_p1), %s304_s27, 128, %s306_s28, %s291_s22  }
  0x72 PF: > { %s317_s7 = sand.u32 1, %s660_s9   ;;  %p440_p9 = pnand %p410_p2, %p796_p3 }
  0x73   : > { %s318_s16 = scalar_lea.sflag [#allocation5], %s317_s7 }
  0x74   : > { %p441_p10 = pneg %p440_p9 }
  0x76   : > { %655 = dma.done.wait (%p441_p10), %s318_s16, 128  }
  0x77   : > { %657 = vsyncadd (%p441_p10), %s318_s16, 4294967168  ;;  %s21_s17 = sadd.s32 1, %s692_s17   ;;  %s892_s15 = sld [smem:[#allocation12_spill]] }
  0x78   : > { %p18_p6 = scmp.ge.s32.totalorder %s21_s17, 4   ;;  %s893_s16 = sld [smem:[#allocation13_spill]] }
  0x79   : > { %s894_s9 = smov %s664_s10  ;;  %s895_s10 = smov %s668_s11 }
  0x7a   : > { %s896_s11 = smov %s782_s29  ;;  %s897_s12 = smov %s676_s13 }
  0x7b   : > { %s898_s13 = smov %s680_s14  ;;  %s899_s14 = smov %s785_s30 }
  0x7c   :  { %20 = sbr.rel (!%p18_p6) target bundleno = 12 (0xc), region = 102 }
  0x81   :  { %324 = vsyncpa [#allocation4], 1 }
  0x82   :  { %326 = vsyncpa [#allocation4 + $0x1], 1 }
  0x83   :  { %327 = vsyncpa [#allocation7], 1 }
  0x84   :  { %329 = vsyncpa [#allocation7 + $0x1], 1 }
  0x85   :  { %330 = vsyncpa [#allocation5], 1 }
  0x86   :  { %332 = vsyncpa [#allocation5 + $0x1], 1 }

</bundles_post_ra>
